<compile_context>
chip_gen: v7x
topology: tpu7x:2x2x1
jax: 0.10.0
libtpu: 0.0.40
codegen_flags: <defaults>
</compile_context>

<pallas_src>
import functools

import jax
import jax.numpy as jnp
from jax.experimental import pallas as pl
from jax.experimental.pallas import tpu as pltpu

RMAX = 6.0

# Membership constants (derived from RMAX only).
_D = RMAX / 2.0            # 3.0
_C = _D / 3.0              # 1.0
_A = RMAX / 4.0            # 1.5
_M = RMAX / 2.0            # 3.0
_B = _M + _A               # 4.5
_R = RMAX / 2.0            # 3.0
_Q = _R + RMAX / 4.0       # 4.5
_INV_DC = 1.0 / (_D - _C)
_INV_MA = 1.0 / (_M - _A)
_INV_QR = 1.0 / (_Q - _R)

# The kernel folds branches that are dead for these constants.  Guard against
# a future RMAX change silently invalidating the simplifications:
#   * b > a      ->  (x>a)|(x>b) == (x>a) and the (x>b)&(x>m) arm is dead.
#   * c < d      ->  m1 is a well-formed ramp, m1 in [0, 1].
#   * 1 <= r < q ->  m1 <= 1 <= r, so both m3 guards are dead.
assert _B > _A
assert _C < _D
assert _R >= 1.0 and _Q > _R

_LANES = 128   # lane width of every vreg
_SLAB = 16     # sublane rows per in-kernel slab (each (SLAB,128) f32 = 2 vregs)


def _round_up(x, m):
    return ((x + m - 1) // m) * m


def _fuzzy_pool_kernel(p_ref, o_ref, *, k, n_slabs):
    """p_ref: (k*k, TM, 128) f32 patch elements; o_ref: (TM, 128) pooled out."""
    kk = k * k

    def slab(off):
        rows = pl.ds(off, _SLAB)

        # col_m1[t] = sum_p m1[p*k + t]  (sum over W-offset p, per H-offset t)
        # row_x[p]  = sum_q  x[p*k + q]  (sum over H-offset q, per W-offset p)
        col_m1 = [None] * k
        col_m2 = [None] * k
        row_x = [None] * k

        for p in range(k):
            for q in range(k):
                x = p_ref[p * k + q, rows, :]                     # (SLAB, 128)
                # m1 = where(x>d, 0, where(x<c, 1, (d-x)/(d-c)))  == clip(...)
                m1 = jnp.clip((_D - x) * _INV_DC, 0.0, 1.0)
                # m2 = where(x>a, 0, (x-a)/(m-a))  == min(..., 0)   (b > a)
                m2 = jnp.minimum((x - _A) * _INV_MA, 0.0)
                col_m1[q] = m1 if col_m1[q] is None else col_m1[q] + m1
                col_m2[q] = m2 if col_m2[q] is None else col_m2[q] + m2
                row_x[p] = x if row_x[p] is None else row_x[p] + x

        s1 = col_m1[0]
        s2 = col_m2[0]
        for t in range(1, k):
            s1 = s1 + col_m1[t]
            s2 = s2 + col_m2[t]
        # m3 = (m1 - r)/(q - r) everywhere (m1 <= 1 <= r kills both guards),
        # so its sums are affine maps of the m1 sums.
        s3 = (s1 - kk * _R) * _INV_QR

        # torch.argmax(dim=1) over [s1, s2, s3]; first occurrence wins ties.
        pick1 = (s1 >= s2) & (s1 >= s3)
        pick2 = jnp.logical_not(pick1) & (s2 >= s3)

        pa_sum = jnp.where(pick1, s1, jnp.where(pick2, s2, s3))
        pa_sum = jnp.where(pa_sum == 0.0, 1.0, pa_sum)

        # sum_{i,j} (PA @ X)[i,j] = sum_t (sum_p PA[p,t]) * (sum_q X[t,q])
        total = None
        for t in range(k):
            col_m3_t = (col_m1[t] - k * _R) * _INV_QR
            col_pa = jnp.where(pick1, col_m1[t],
                               jnp.where(pick2, col_m2[t], col_m3_t))
            term = col_pa * row_x[t]
            total = term if total is None else total + term

        # Exact division (previous approx reciprocal caused the 0.036 error).
        o_ref[rows, :] = total / pa_sum

    if n_slabs == 1:
        slab(0)
    else:
        def body(s, carry):
            slab(pl.multiple_of(s * _SLAB, _SLAB))
            return carry
        jax.lax.fori_loop(0, n_slabs, body, None)


def extract_patches(x, k, s):
    """(B, C, W, H) -> (k*k, N) with N enumerating (b, c, i, j) row-major and
    patch-element order (p over W, q over H), matching torch unfold/reshape."""
    B, C, W, H = x.shape
    nW = (W - k) // s + 1
    nH = (H - k) // s + 1
    cols = []
    for p in range(k):
        for q in range(k):
            sl = x[:, :, p: p + s * (nW - 1) + 1: s, q: q + s * (nH - 1) + 1: s]
            cols.append(sl.reshape(-1))
    patches = jnp.stack(cols, axis=0)    # (k*k, N)
    return patches, (B, C, nW, nH)


def fuzzy_pool2d(x, kernel_size=2, stride=2, tile_rows=1024):
    """FuzzyPool2d forward. x: (B, C, W, H) -> (B, C, nW, nH)."""
    x = x.astype(jnp.float32)
    k = kernel_size
    kk = k * k
    patches, (B, C, nW, nH) = extract_patches(x, k, stride)
    _, N = patches.shape

    # Lane-dense relayout: N -> (rows, 128); tm sublane rows per grid step.
    rows = pl.cdiv(N, _LANES)
    n_steps = max(1, pl.cdiv(rows, tile_rows))
    # Keep >= 2 grid steps when the problem is big enough so the "parallel"
    # axis can shard across both v7x TensorCores.
    if n_steps == 1 and rows >= 2 * _SLAB:
        n_steps = 2
    # Balance tm so padding is bounded by < one slab per step (instead of
    # rounding rows up to a multiple of tile_rows).
    tm = _round_up(pl.cdiv(rows, n_steps), _SLAB)
    rows_pad = n_steps * tm
    n_pad = rows_pad * _LANES
    if n_pad != N:
        patches = jnp.pad(patches, ((0, 0), (0, n_pad - N)))
    patches = patches.reshape(kk, rows_pad, _LANES)

    kern = functools.partial(_fuzzy_pool_kernel, k=k, n_slabs=tm // _SLAB)
    out = pl.pallas_call(
        kern,
        out_shape=jax.ShapeDtypeStruct((rows_pad, _LANES), jnp.float32),
        grid_spec=pltpu.PrefetchScalarGridSpec(
            num_scalar_prefetch=0,
            grid=(n_steps,),
            in_specs=[pl.BlockSpec((kk, tm, _LANES), lambda i: (0, i, 0))],
            out_specs=pl.BlockSpec((tm, _LANES), lambda i: (i, 0)),
        ),
        compiler_params=pltpu.CompilerParams(
            dimension_semantics=("parallel",),
        ),
    )(patches)

    return out.reshape(-1)[:N].reshape(B, C, nW, nH)


def fuzzy_pool2d_reference(x, k=2, s=2):
    """Pure-JAX reference mirroring the PyTorch forward verbatim (full original
    membership branching), used to validate the kernel's simplifications."""
    patches, (B, C, nW, nH) = extract_patches(x.astype(jnp.float32), k, s)
    xp = patches.T                                   # (N, k*k)
    rmax = 6.0
    d = rmax / 2.0
    c = d / 3.0
    m1 = jnp.where(xp > d, 0.0, jnp.where(xp < c, 1.0, (-xp + d) / (d - c)))
    a = rmax / 4.0
    m = rmax / 2.0
    b = m + a
    m2 = jnp.where((xp > a) | (xp > b), 0.0,
                   jnp.where((xp > b) & (xp > m), (-xp + b) / (b - m),
                             (xp - a) / (m - a)))
    r = rmax / 2.0
    q = r + rmax / 4.0
    m3 = jnp.where(m1 > r, 0.0, jnp.where(m1 > q, 1.0, (m1 - r) / (q - r)))
    ms = jnp.stack([m1, m2, m3], axis=1)             # (N, 3, k*k)
    spi = ms.sum(axis=2)                             # (N, 3)
    arg = jnp.argmax(spi, axis=1)                    # first occurrence
    pa = jnp.take_along_axis(ms, arg[:, None, None], axis=1)[:, 0, :]
    pa_sum = pa.sum(axis=1)
    pa_sum = jnp.where(pa_sum == 0.0, 1.0, pa_sum)
    A = pa.reshape(-1, k, k)
    X = xp.reshape(-1, k, k)
    inner = jnp.einsum("nij,njk->nik", A, X).reshape(-1, k * k).sum(axis=1)
    return (inner / pa_sum).reshape(B, C, nW, nH)


if __name__ == "__main__":
    key = jax.random.PRNGKey(0)
    k1, k2 = jax.random.split(key)

    # Primary case: small module-consistent shape; values straddle every
    # membership breakpoint (including negatives).
    x = jax.random.uniform(k1, (2, 4, 16, 16), dtype=jnp.float32,
                           minval=-1.0, maxval=7.0)
    out = jax.block_until_ready(fuzzy_pool2d(x, kernel_size=2, stride=2))
    assert out.shape == (2, 4, 8, 8), out.shape
    ref = fuzzy_pool2d_reference(x, 2, 2)
    err = float(jnp.max(jnp.abs(out - ref)))
    assert jnp.allclose(out, ref, rtol=1e-3, atol=1e-3), err

    # Second case exercises the multi-step grid and the in-kernel slab loop.
    x2 = jax.random.uniform(k2, (2, 4, 64, 64), dtype=jnp.float32,
                            minval=-1.0, maxval=7.0)
    out2 = jax.block_until_ready(fuzzy_pool2d(x2, kernel_size=2, stride=2))
    assert out2.shape == (2, 4, 32, 32), out2.shape
    ref2 = fuzzy_pool2d_reference(x2, 2, 2)
    err2 = float(jnp.max(jnp.abs(out2 - ref2)))
    assert jnp.allclose(out2, ref2, rtol=1e-3, atol=1e-3), err2

    print("KERNEL_OK")
</pallas_src>

<mosaic_0001>
module attributes {stable_mosaic.version = 11 : i64} {
  func.func @_fuzzy_pool_kernel(%arg0: i32, %arg1: memref<4x16x128xf32, #tpu.memory_space<vmem>>, %arg2: memref<16x128xf32, #tpu.memory_space<vmem>>) attributes {dimension_semantics = [#tpu.dimension_semantics<parallel>], iteration_bounds = array<i64: 1>, scalar_prefetch = 0 : i64, scratch_operands = 0 : i64, tpu.core_type = #tpu.core_type<tc>, window_params = [{transform_indices = @transform_0, window_bounds = array<i64: 4, 16, 128>}, {transform_indices = @transform_1, window_bounds = array<i64: 16, 128>}]} {
    %c0 = arith.constant 0 : index
    %c0_0 = arith.constant 0 : index
    %c0_1 = arith.constant 0 : index
    %0 = vector.load %arg1[%c0, %c0_0, %c0_1] : memref<4x16x128xf32, #tpu.memory_space<vmem>>, vector<1x16x128xf32>
    %1 = vector.shape_cast %0 : vector<1x16x128xf32> to vector<16x128xf32>
    %cst = arith.constant 3.000000e+00 : f32
    %2 = vector.broadcast %cst : f32 to vector<16x128xf32>
    %3 = arith.subf %2, %1 : vector<16x128xf32>
    %cst_2 = arith.constant 5.000000e-01 : f32
    %4 = vector.broadcast %cst_2 : f32 to vector<16x128xf32>
    %5 = arith.mulf %3, %4 : vector<16x128xf32>
    %cst_3 = arith.constant 0.000000e+00 : f32
    %cst_4 = arith.constant 1.000000e+00 : f32
    %6 = vector.broadcast %cst_3 : f32 to vector<16x128xf32>
    %7 = arith.maximumf %6, %5 : vector<16x128xf32>
    %8 = vector.broadcast %cst_4 : f32 to vector<16x128xf32>
    %9 = arith.minimumf %8, %7 : vector<16x128xf32>
    %cst_5 = arith.constant 1.500000e+00 : f32
    %10 = vector.broadcast %cst_5 : f32 to vector<16x128xf32>
    %11 = arith.subf %1, %10 : vector<16x128xf32>
    %cst_6 = arith.constant 0.666666686 : f32
    %12 = vector.broadcast %cst_6 : f32 to vector<16x128xf32>
    %13 = arith.mulf %11, %12 : vector<16x128xf32>
    %cst_7 = arith.constant 0.000000e+00 : f32
    %14 = vector.broadcast %cst_7 : f32 to vector<16x128xf32>
    %15 = arith.minimumf %13, %14 : vector<16x128xf32>
    %c1 = arith.constant 1 : index
    %c0_8 = arith.constant 0 : index
    %c0_9 = arith.constant 0 : index
    %16 = vector.load %arg1[%c1, %c0_8, %c0_9] : memref<4x16x128xf32, #tpu.memory_space<vmem>>, vector<1x16x128xf32>
    %17 = vector.shape_cast %16 : vector<1x16x128xf32> to vector<16x128xf32>
    %cst_10 = arith.constant 3.000000e+00 : f32
    %18 = vector.broadcast %cst_10 : f32 to vector<16x128xf32>
    %19 = arith.subf %18, %17 : vector<16x128xf32>
    %cst_11 = arith.constant 5.000000e-01 : f32
    %20 = vector.broadcast %cst_11 : f32 to vector<16x128xf32>
    %21 = arith.mulf %19, %20 : vector<16x128xf32>
    %cst_12 = arith.constant 0.000000e+00 : f32
    %cst_13 = arith.constant 1.000000e+00 : f32
    %22 = vector.broadcast %cst_12 : f32 to vector<16x128xf32>
    %23 = arith.maximumf %22, %21 : vector<16x128xf32>
    %24 = vector.broadcast %cst_13 : f32 to vector<16x128xf32>
    %25 = arith.minimumf %24, %23 : vector<16x128xf32>
    %cst_14 = arith.constant 1.500000e+00 : f32
    %26 = vector.broadcast %cst_14 : f32 to vector<16x128xf32>
    %27 = arith.subf %17, %26 : vector<16x128xf32>
    %cst_15 = arith.constant 0.666666686 : f32
    %28 = vector.broadcast %cst_15 : f32 to vector<16x128xf32>
    %29 = arith.mulf %27, %28 : vector<16x128xf32>
    %cst_16 = arith.constant 0.000000e+00 : f32
    %30 = vector.broadcast %cst_16 : f32 to vector<16x128xf32>
    %31 = arith.minimumf %29, %30 : vector<16x128xf32>
    %32 = arith.addf %1, %17 : vector<16x128xf32>
    %c2 = arith.constant 2 : index
    %c0_17 = arith.constant 0 : index
    %c0_18 = arith.constant 0 : index
    %33 = vector.load %arg1[%c2, %c0_17, %c0_18] : memref<4x16x128xf32, #tpu.memory_space<vmem>>, vector<1x16x128xf32>
    %34 = vector.shape_cast %33 : vector<1x16x128xf32> to vector<16x128xf32>
    %cst_19 = arith.constant 3.000000e+00 : f32
    %35 = vector.broadcast %cst_19 : f32 to vector<16x128xf32>
    %36 = arith.subf %35, %34 : vector<16x128xf32>
    %cst_20 = arith.constant 5.000000e-01 : f32
    %37 = vector.broadcast %cst_20 : f32 to vector<16x128xf32>
    %38 = arith.mulf %36, %37 : vector<16x128xf32>
    %cst_21 = arith.constant 0.000000e+00 : f32
    %cst_22 = arith.constant 1.000000e+00 : f32
    %39 = vector.broadcast %cst_21 : f32 to vector<16x128xf32>
    %40 = arith.maximumf %39, %38 : vector<16x128xf32>
    %41 = vector.broadcast %cst_22 : f32 to vector<16x128xf32>
    %42 = arith.minimumf %41, %40 : vector<16x128xf32>
    %cst_23 = arith.constant 1.500000e+00 : f32
    %43 = vector.broadcast %cst_23 : f32 to vector<16x128xf32>
    %44 = arith.subf %34, %43 : vector<16x128xf32>
    %cst_24 = arith.constant 0.666666686 : f32
    %45 = vector.broadcast %cst_24 : f32 to vector<16x128xf32>
    %46 = arith.mulf %44, %45 : vector<16x128xf32>
    %cst_25 = arith.constant 0.000000e+00 : f32
    %47 = vector.broadcast %cst_25 : f32 to vector<16x128xf32>
    %48 = arith.minimumf %46, %47 : vector<16x128xf32>
    %49 = arith.addf %9, %42 : vector<16x128xf32>
    %50 = arith.addf %15, %48 : vector<16x128xf32>
    %c3 = arith.constant 3 : index
    %c0_26 = arith.constant 0 : index
    %c0_27 = arith.constant 0 : index
    %51 = vector.load %arg1[%c3, %c0_26, %c0_27] : memref<4x16x128xf32, #tpu.memory_space<vmem>>, vector<1x16x128xf32>
    %52 = vector.shape_cast %51 : vector<1x16x128xf32> to vector<16x128xf32>
    %cst_28 = arith.constant 3.000000e+00 : f32
    %53 = vector.broadcast %cst_28 : f32 to vector<16x128xf32>
    %54 = arith.subf %53, %52 : vector<16x128xf32>
    %cst_29 = arith.constant 5.000000e-01 : f32
    %55 = vector.broadcast %cst_29 : f32 to vector<16x128xf32>
    %56 = arith.mulf %54, %55 : vector<16x128xf32>
    %cst_30 = arith.constant 0.000000e+00 : f32
    %cst_31 = arith.constant 1.000000e+00 : f32
    %57 = vector.broadcast %cst_30 : f32 to vector<16x128xf32>
    %58 = arith.maximumf %57, %56 : vector<16x128xf32>
    %59 = vector.broadcast %cst_31 : f32 to vector<16x128xf32>
    %60 = arith.minimumf %59, %58 : vector<16x128xf32>
    %cst_32 = arith.constant 1.500000e+00 : f32
    %61 = vector.broadcast %cst_32 : f32 to vector<16x128xf32>
    %62 = arith.subf %52, %61 : vector<16x128xf32>
    %cst_33 = arith.constant 0.666666686 : f32
    %63 = vector.broadcast %cst_33 : f32 to vector<16x128xf32>
    %64 = arith.mulf %62, %63 : vector<16x128xf32>
    %cst_34 = arith.constant 0.000000e+00 : f32
    %65 = vector.broadcast %cst_34 : f32 to vector<16x128xf32>
    %66 = arith.minimumf %64, %65 : vector<16x128xf32>
    %67 = arith.addf %25, %60 : vector<16x128xf32>
    %68 = arith.addf %31, %66 : vector<16x128xf32>
    %69 = arith.addf %34, %52 : vector<16x128xf32>
    %70 = arith.addf %49, %67 : vector<16x128xf32>
    %71 = arith.addf %50, %68 : vector<16x128xf32>
    %cst_35 = arith.constant 1.200000e+01 : f32
    %72 = vector.broadcast %cst_35 : f32 to vector<16x128xf32>
    %73 = arith.subf %70, %72 : vector<16x128xf32>
    %cst_36 = arith.constant 0.666666686 : f32
    %74 = vector.broadcast %cst_36 : f32 to vector<16x128xf32>
    %75 = arith.mulf %73, %74 : vector<16x128xf32>
    %76 = arith.cmpf oge, %70, %71 : vector<16x128xf32>
    %77 = arith.cmpf oge, %70, %75 : vector<16x128xf32>
    %78 = arith.andi %76, %77 : vector<16x128xi1>
    %cst_37 = arith.constant dense<true> : vector<16x128xi1>
    %79 = arith.xori %78, %cst_37 : vector<16x128xi1>
    %80 = arith.cmpf oge, %71, %75 : vector<16x128xf32>
    %81 = arith.andi %79, %80 : vector<16x128xi1>
    %82 = arith.select %81, %71, %75 : vector<16x128xi1>, vector<16x128xf32>
    %83 = arith.select %78, %70, %82 : vector<16x128xi1>, vector<16x128xf32>
    %cst_38 = arith.constant 0.000000e+00 : f32
    %84 = vector.broadcast %cst_38 : f32 to vector<16x128xf32>
    %85 = arith.cmpf oeq, %83, %84 : vector<16x128xf32>
    %cst_39 = arith.constant 1.000000e+00 : f32
    %86 = vector.broadcast %cst_39 : f32 to vector<16x128xf32>
    %87 = arith.select %85, %86, %83 : vector<16x128xi1>, vector<16x128xf32>
    %cst_40 = arith.constant 6.000000e+00 : f32
    %88 = vector.broadcast %cst_40 : f32 to vector<16x128xf32>
    %89 = arith.subf %49, %88 : vector<16x128xf32>
    %cst_41 = arith.constant 0.666666686 : f32
    %90 = vector.broadcast %cst_41 : f32 to vector<16x128xf32>
    %91 = arith.mulf %89, %90 : vector<16x128xf32>
    %92 = arith.select %81, %50, %91 : vector<16x128xi1>, vector<16x128xf32>
    %93 = arith.select %78, %49, %92 : vector<16x128xi1>, vector<16x128xf32>
    %94 = arith.mulf %93, %32 : vector<16x128xf32>
    %cst_42 = arith.constant 6.000000e+00 : f32
    %95 = vector.broadcast %cst_42 : f32 to vector<16x128xf32>
    %96 = arith.subf %67, %95 : vector<16x128xf32>
    %cst_43 = arith.constant 0.666666686 : f32
    %97 = vector.broadcast %cst_43 : f32 to vector<16x128xf32>
    %98 = arith.mulf %96, %97 : vector<16x128xf32>
    %99 = arith.select %81, %68, %98 : vector<16x128xi1>, vector<16x128xf32>
    %100 = arith.select %78, %67, %99 : vector<16x128xi1>, vector<16x128xf32>
    %101 = arith.mulf %100, %69 : vector<16x128xf32>
    %102 = arith.addf %94, %101 : vector<16x128xf32>
    %103 = arith.divf %102, %87 : vector<16x128xf32>
    %c0_44 = arith.constant 0 : index
    %c0_45 = arith.constant 0 : index
    %104 = vector.load %arg2[%c0_44, %c0_45] : memref<16x128xf32, #tpu.memory_space<vmem>>, vector<16x128xf32>
    tpu.vector_store %arg2[%c0_44, %c0_45], %103 {strides = array<i32>} : memref<16x128xf32, #tpu.memory_space<vmem>>, vector<16x128xf32>,
    return
  }
  func.func @transform_0(%arg0: i32) -> (i32, i32, i32) {
    %c0_i32 = arith.constant 0 : i32
    %c0_i32_0 = arith.constant 0 : i32
    %c0_i32_1 = arith.constant 0 : i32
    return %c0_i32, %arg0, %c0_i32_0 : i32, i32, i32
  }
  func.func @transform_1(%arg0: i32) -> (i32, i32) {
    %c0_i32 = arith.constant 0 : i32
    %c0_i32_0 = arith.constant 0 : i32
    return %arg0, %c0_i32 : i32, i32
  }
}

</mosaic_0001>

<bundles_post_ra>
// kernel: tpu_custom_call.1
= control target key start
LH: loop header
LB: loop body
LE: loop exit
PB: predicated region body
PF: predicated region fallthrough
CT: control target
= control target key end

     0   :  { %6 = vsyncpa [#allocation3], 0  ;;  %s371_s0 = inlined_call_operand.hbm [shape: f32[4,16,128], index: 0, kind: input, shape index: {}]   ;;  %s372_s1 = inlined_call_operand.hbm [shape: f32[16,128], index: 1, kind: output, shape index: {}]  }
   0x1   :  { %7 = vsyncpa [#allocation4], 0  ;;  %s246_s6 = smov [#allocation2]   ;;  %s198_s10 = scalar_lea.hbm %s371_s0, 1024 }
   0x2   :  { %s13_s7 = sshll.u32 %s246_s6, 4  ;;  %p199_p0 = scmp.ne.s32.totalorder %s371_s0, %s198_s10  ;;  %s14_s7 = int_to_ptr.vmem [resolvable:$true] %s13_s7 }
   0x3   :  { %p202_p1 = scmp.lt.u32.totalorder %s198_s10, %s371_s0 }
   0x5   :  { %p204_p2 = pnand %p202_p1, %p199_p0 }
   0x7   :  { %207 = shalt.err (!%p204_p2)
}
   0x8   :  { %s208_s15 = scalar_lea.vmem %s14_s7, 1024  ;;  %p213_p4 = scmp.lt.s32.totalorder %s14_s7, %s14_s7 }
   0x9   :  { %p209_p3 = scmp.ne.s32.totalorder %s14_s7, %s208_s15  ;;  %p214_p5 = scmp.lt.s32.totalorder %s208_s15, %s208_s15 }
   0xb   :  { %p215_p6 = por %p214_p5, %p213_p4 }
   0xd   :  { %p216_p7 = pnand %p215_p6, %p209_p3 }
   0xf   :  { %219 = shalt.err (!%p216_p7)
}
  0x10   :  { %s247_s16 = smov 128   ;;  %s248_s17 = smov 8  }
  0x11   :  { %19 = dma.hbm_to_vmem [thread:$0]  %s371_s0, 1024, %s14_s7, [#allocation3], %s247_s16, %s247_s16, %s248_s17  }
  0x12   :  { %242 = dma.done.wait [#allocation3], 1024  }
  0x13   :  { %243 = vsyncadd [#allocation3], 4294966272  ;;  %v276_v0 = vld [vmem:[#allocation2] sm:$0xff]  ;;  %v278_v1 = vld [vmem:[#allocation2 + $0x10] sm:$0xff]  ;;  %vm249_vm4 = vmmov 1   ;;  %s250_s0 = smov [#allocation5]  }
  0x14   :  { %v280_v2 = vld [vmem:[#allocation2 + $0x20] sm:$0xff]  ;;  %v25_v3 = vsub.f32 3.0, %v276_v0  ;;  %v175_v4 = vadd.f32 -1.5, %v276_v0  ;;  %v42_v5 = vsub.f32 3.0, %v278_v1  ;;  %v177_v6 = vadd.f32 -1.5, %v278_v1  ;;  %v286_v7 = vld [vmem:[#allocation2 + $0x30] sm:$0xff] }
  0x15   :  { %v61_v8 = vsub.f32 3.0, %v280_v2  ;;  %v179_v9 = vadd.f32 -1.5, %v280_v2  ;;  %v82_v10 = vsub.f32 3.0, %v286_v7  ;;  %v181_v18 = vadd.f32 -1.5, %v286_v7  ;;  %v292_v19 = vld [vmem:[#allocation2 + $0x8] sm:$0xff]  ;;  %v294_v28 = vld [vmem:[#allocation2 + $0x18] sm:$0xff] }
  0x16   :  { %v27_v11 = vmul.f32 0.5, %v25_v3  ;;  %v35_v12 = vmul.f32 0.6666667, %v175_v4  ;;  %v44_v13 = vmul.f32 0.5, %v42_v5  ;;  %v52_v14 = vmul.f32 0.6666667, %v177_v6 }
  0x17   :  { %v63_v15 = vmul.f32 0.5, %v61_v8  ;;  %v71_v16 = vmul.f32 0.6666667, %v179_v9  ;;  %v84_v17 = vmul.f32 0.5, %v82_v10  ;;  %v92_v27 = vmul.f32 0.6666667, %v181_v18 }
  0x18   :  { %v29_v20 = vmax.f32 %v27_v11, 0.0  ;;  %v37_v21 = vmin.f32 %v35_v12, 0.0  ;;  %v46_v22 = vmax.f32 %v44_v13, 0.0  ;;  %v54_v23 = vmin.f32 %v52_v14, 0.0  ;;  %v303_v48 = vld [vmem:[#allocation2 + $0x28] sm:$0xff]  ;;  %v305_v49 = vld [vmem:[#allocation2 + $0x38] sm:$0xff] }
  0x19   :  { %v65_v24 = vmax.f32 %v63_v15, 0.0  ;;  %v73_v25 = vmin.f32 %v71_v16, 0.0  ;;  %v86_v26 = vmax.f32 %v84_v17, 0.0  ;;  %v26_v31 = vsub.f32 3.0, %v292_v19  ;;  %s163_s20 = sshll.u32 %s250_s0, 4  ;;  %s164_s20 = int_to_ptr.vmem [resolvable:$true] %s163_s20 }
  0x1a   :  { %v31_v29 = vmin.f32 %v29_v20, 1.0  ;;  %v48_v30 = vmin.f32 %v46_v22, 1.0  ;;  %v94_v35 = vmin.f32 %v92_v27, 0.0  ;;  %v176_v37 = vadd.f32 -1.5, %v292_v19  ;;  %s220_s21 = scalar_lea.vmem %s164_s20, 256  ;;  %p225_p9 = scmp.lt.s32.totalorder %s164_s20, %s164_s20 }
  0x1b   :  { %v67_v32 = vmin.f32 %v65_v24, 1.0  ;;  %v297_v33 = vadd.f32 %v73_v25, %v37_v21  ;;  %v88_v34 = vmin.f32 %v86_v26, 1.0  ;;  %v28_v36 = vmul.f32 0.5, %v26_v31  ;;  %p221_p8 = scmp.ne.s32.totalorder %s164_s20, %s220_s21  ;;  %p226_p10 = scmp.lt.s32.totalorder %s220_s21, %s220_s21 }
  0x1c   :  { %v43_v38 = vsub.f32 3.0, %v294_v28  ;;  %v178_v39 = vadd.f32 -1.5, %v294_v28  ;;  %v98_v42 = vadd.f32 %v94_v35, %v54_v23  ;;  %v36_v44 = vmul.f32 0.6666667, %v176_v37 }
  0x1d   :  { %v75_v40 = vadd.f32 %v67_v32, %v31_v29  ;;  %v96_v41 = vadd.f32 %v88_v34, %v48_v30  ;;  %v30_v43 = vmax.f32 %v28_v36, 0.0  ;;  %v62_v56 = vsub.f32 3.0, %v303_v48  ;;  %p227_p11 = por %p226_p10, %p225_p9 }
  0x1e   :  { %v104_v46 = vadd.f32 %v98_v42, %v297_v33  ;;  %v45_v47 = vmul.f32 0.5, %v43_v38  ;;  %v53_v50 = vmul.f32 0.6666667, %v178_v39  ;;  %v38_v55 = vmin.f32 %v36_v44, 0.0 }
  0x1f   :  { %v102_v45 = vadd.f32 %v96_v41, %v75_v40  ;;  %v185_v52 = vadd.f32 -6.0, %v75_v40  ;;  %v187_v53 = vadd.f32 -6.0, %v96_v41  ;;  %v32_v54 = vmin.f32 %v30_v43, 1.0  ;;  %p228_p12 = pnand %p227_p11, %p221_p8 }
  0x20   :  { %v180_v57 = vadd.f32 -1.5, %v303_v48  ;;  %v83_v58 = vsub.f32 3.0, %v305_v49  ;;  %v47_v60 = vmax.f32 %v45_v47, 0.0  ;;  %v182_v61 = vadd.f32 -1.5, %v305_v49 }
  0x21   :  { %v183_v51 = vadd.f32 -12.0, %v102_v45  ;;  %vm110_vm0 = vcmp.ge.f32.partialorder %v102_v45, %v104_v46  ;;  %v55_v62 = vmin.f32 %v53_v50, 0.0  ;;  %v64_v63 = vmul.f32 0.5, %v62_v56 }
  0x22   :  { %v72_v3 = vmul.f32 0.6666667, %v180_v57  ;;  %v85_v4 = vmul.f32 0.5, %v83_v58  ;;  %v132_v5 = vmul.f32 0.6666667, %v185_v52  ;;  %v49_v13 = vmin.f32 %v47_v60, 1.0 }
  0x23   :  { %v108_v59 = vmul.f32 0.6666667, %v183_v51  ;;  %v93_v6 = vmul.f32 0.6666667, %v182_v61  ;;  %v142_v9 = vmul.f32 0.6666667, %v187_v53  ;;  %v56_v27 = vadd.f32 %v278_v1, %v276_v0 }
  0x24   :  { %v66_v10 = vmax.f32 %v64_v63, 0.0  ;;  %v74_v11 = vmin.f32 %v72_v3, 0.0  ;;  %v87_v12 = vmax.f32 %v85_v4, 0.0  ;;  %v100_v29 = vadd.f32 %v286_v7, %v280_v2 }
  0x25   :  { %vm112_vm1 = vcmp.ge.f32.partialorder %v102_v45, %v108_v59  ;;  %vm118_vm2 = vcmp.ge.f32.partialorder %v104_v46, %v108_v59  ;;  %v95_v14 = vmin.f32 %v93_v6, 0.0  ;;  %v57_v47 = vadd.f32 %v294_v28, %v292_v19 }
  0x26   :  { %vm311_vm3 = vmand %vm110_vm0, %vm112_vm1  ;;  %v68_v16 = vmin.f32 %v66_v10, 1.0  ;;  %v89_v17 = vmin.f32 %v87_v12, 1.0  ;;  %v78_v21 = vadd.f32 %v74_v11, %v38_v55  ;;  %v101_v50 = vadd.f32 %v305_v49, %v303_v48 }
  0x27   :  { %vm116_vm5 = vmxor %vm311_vm3, %vm249_vm4  ;;  %v99_v22 = vadd.f32 %v95_v14, %v55_v62 }
  0x28   :  { %vm318_vm6 = vmand %vm116_vm5, %vm118_vm2  ;;  %v76_v25 = vadd.f32 %v68_v16, %v32_v54  ;;  %v97_v26 = vadd.f32 %v89_v17, %v49_v13 }
  0x29   :  { %v122_v18 = vsel %vm318_vm6, %v104_v46, %v108_v59  ;;  %v134_v20 = vsel %vm318_vm6, %v297_v33, %v132_v5  ;;  %v144_v24 = vsel %vm318_vm6, %v98_v42, %v142_v9  ;;  %v105_v34 = vadd.f32 %v99_v22, %v78_v21 }
  0x2a   :  { %v124_v23 = vsel %vm311_vm3, %v102_v45, %v122_v18  ;;  %v136_v31 = vsel %vm311_vm3, %v75_v40, %v134_v20  ;;  %v146_v32 = vsel %vm311_vm3, %v96_v41, %v144_v24  ;;  %v103_v33 = vadd.f32 %v97_v26, %v76_v25 }
  0x2b   :  { %vm126_vm7 = vcmp.eq.f32.partialorder %v124_v23, 0.0  ;;  %v138_v36 = vmul.f32 %v136_v31, %v56_v27  ;;  %v148_v37 = vmul.f32 %v146_v32, %v100_v29  ;;  %v186_v38 = vadd.f32 -6.0, %v76_v25 }
  0x2c   :  { %v128_v30 = vsel %vm126_vm7, 1.0, %v124_v23  ;;  %v184_v35 = vadd.f32 -12.0, %v103_v33  ;;  %v188_v39 = vadd.f32 -6.0, %v97_v26  ;;  %vm111_vm8 = vcmp.ge.f32.partialorder %v103_v33, %v105_v34 }
  0x2d   :  { %194 = vrcp.f32 %v128_v30  ;;  %v150_v0 = vadd.f32 %v148_v37, %v138_v36  ;;  %v133_v2 = vmul.f32 0.6666667, %v186_v38 }
  0x2e   :  { %v109_v42 = vmul.f32 0.6666667, %v184_v35  ;;  %v143_v7 = vmul.f32 0.6666667, %v188_v39 }
  0x30   :  { %vm113_vm9 = vcmp.ge.f32.partialorder %v103_v33, %v109_v42  ;;  %vm119_vm10 = vcmp.ge.f32.partialorder %v105_v34, %v109_v42 }
  0x31   :  { %vm339_vm11 = vmand %vm111_vm8, %vm113_vm9 }
  0x32   :  { %vm117_vm12 = vmxor %vm339_vm11, %vm249_vm4 }
  0x33   :  { %vm121_vm13 = vmand %vm117_vm12, %vm119_vm10 }
  0x34   :  { %v123_v41 = vsel %vm121_vm13, %v105_v34, %v109_v42  ;;  %v135_v45 = vsel %vm121_vm13, %v78_v21, %v133_v2  ;;  %v145_v46 = vsel %vm121_vm13, %v99_v22, %v143_v7 }
  0x35   :  { %v125_v44 = vsel %vm339_vm11, %v103_v33, %v123_v41  ;;  %v137_v52 = vsel %vm339_vm11, %v76_v25, %v135_v45  ;;  %v147_v53 = vsel %vm339_vm11, %v97_v26, %v145_v46 }
  0x36   :  { %vm127_vm14 = vcmp.eq.f32.partialorder %v125_v44, 0.0  ;;  %v139_v54 = vmul.f32 %v137_v52, %v57_v47  ;;  %v149_v55 = vmul.f32 %v147_v53, %v101_v50 }
  0x37   :  { %v195_v40 = vpop.eup %194  ;;  %v129_v51 = vsel %vm127_vm14, 1.0, %v125_v44 }
  0x38   :  { %v153_v43 = vmul.f32 %v195_v40, %v150_v0  ;;  %196 = vrcp.f32 %v129_v51  ;;  %v151_v56 = vadd.f32 %v149_v55, %v139_v54 }
  0x3a   :  { %156 = vst [vmem:[#allocation5] sm:$0xff] %v153_v43 }
  0x42   :  { %v197_v57 = vpop.eup %196 }
  0x43   :  { %v155_v58 = vmul.f32 %v197_v57, %v151_v56 }
  0x45   :  { %157 = vst [vmem:[#allocation5 + $0x8] sm:$0xff] %v155_v58 }
  0x46   :  { %231 = shalt.err (!%p228_p12)
}
  0x47   :  { %s232_s24 = scalar_lea.hbm %s372_s1, 256 }
  0x48   :  { %p233_p13 = scmp.ne.s32.totalorder %s372_s1, %s232_s24  ;;  %p236_p0 = scmp.lt.u32.totalorder %s232_s24, %s372_s1 }
  0x4a   :  { %p238_p1 = pnand %p236_p0, %p233_p13 }
  0x4c   :  { %241 = shalt.err (!%p238_p1)
}
  0x4d   :  { %169 = dma.vmem_to_hbm [thread:$0]  %s164_s20, 256, %s372_s1, [#allocation4], %s247_s16, %s247_s16, %s248_s17  }
  0x4e   :  { %244 = dma.done.wait [#allocation4], 256  }
  0x4f   :  { %245 = vsyncadd [#allocation4], 4294967040 }
  0x50   :  { %173 = vsyncpa [#allocation3], 1 }
  0x51   :  { %174 = vsyncpa [#allocation4], 1 }

</bundles_post_ra>
